<compile_context>
chip_gen: v6e
topology: v6e:2x2x1
jax: 0.10.0
libtpu: 0.0.40
codegen_flags: <defaults>
</compile_context>

<pallas_src>
import math

import numpy as np
import jax
import jax.numpy as jnp
from jax import lax
from jax.experimental import pallas as pl
from jax.experimental.pallas import tpu as pltpu


_B_PAD = 128     # scaling-table rows padded to a full lane width (gather K dim)
_B_ALIGN = 8     # sublane alignment for the small per-batch accumulators
_TILE = 1024     # voxel rows per grid step
_NCORES = 2      # leading "parallel" axis for the pooling reduction (v7x)


def _erf_approx(x):
    # Abramowitz & Stegun 7.1.26, |abs err| <= 1.5e-7; reproduces exact-GELU
    # (nn.GELU default) to f32 precision with ops that always lower in Mosaic.
    a1, a2, a3, a4, a5 = (0.254829592, -0.284496736, 1.421413741,
                          -1.453152027, 1.061405429)
    p = 0.3275911
    z = jnp.abs(x)
    t = 1.0 / (1.0 + p * z)
    poly = ((((a5 * t + a4) * t + a3) * t + a2) * t + a1) * t
    y = 1.0 - poly * jnp.exp(-z * z)
    return jnp.where(x >= 0, y, -y)


def _gelu_exact(x):
    return 0.5 * x * (1.0 + _erf_approx(x * (1.0 / math.sqrt(2.0))))


def _sigmoid(x):
    return 1.0 / (1.0 + jnp.exp(-x))


def se_pool_partial_kernel(feats_ref, bidx_ref, psum_ref, pcnt_ref):
    """Per-core partial segment sums / counts over voxel tiles."""
    t = pl.program_id(1)

    @pl.when(t == 0)
    def _():
        psum_ref[...] = jnp.zeros_like(psum_ref)
        pcnt_ref[...] = jnp.zeros_like(pcnt_ref)

    f = feats_ref[...]                                        # (tile, C) f32
    tile = f.shape[0]
    b_acc = psum_ref.shape[0]
    # One-hot built directly in (B_ACC, tile) orientation: pure VPU compares,
    # no XLU transpose.  Padded voxel rows carry batch index -1 -> zero column.
    rows = lax.broadcasted_iota(jnp.int32, (b_acc, tile), 0)
    onehot_t = (bidx_ref[...] == rows).astype(jnp.float32)    # (B_ACC, tile)
    # Scatter-add of feature sums via the MXU; counts via an XLU lane-sum.
    psum_ref[...] += jnp.dot(onehot_t, f, preferred_element_type=jnp.float32)
    pcnt_ref[...] += jnp.sum(onehot_t, axis=-1, keepdims=True)


def se_mlp_kernel(psum_ref, pcnt_ref, glob_ref, gw_ref,
                  wg_ref, bg_ref, w1a_ref, w1b_ref, b1_ref, w2_ref, b2_ref,
                  scaling_ref):
    """Combine per-core partials, per-batch mean, then the SE MLP head."""
    sums = psum_ref[0]
    cnts = pcnt_ref[0]
    for i in range(1, psum_ref.shape[0]):                     # static unroll
        sums = sums + psum_ref[i]
        cnts = cnts + pcnt_ref[i]
    # MinkowskiGlobalAvgPooling: per-batch mean (empty/pad rows -> 0, not NaN).
    pooled = sums / jnp.maximum(cnts, 1.0)                    # (B_ACC, C)
    # glob_transform(global_feature) * global_weight
    gt = jnp.dot(glob_ref[...], wg_ref[...],
                 preferred_element_type=jnp.float32) + bg_ref[...]
    gt = gt * gw_ref[0]
    # fc: Linear(2C -> C//r); torch.cat realized as a split matmul.
    h = (jnp.dot(pooled, w1a_ref[...], preferred_element_type=jnp.float32)
         + jnp.dot(gt, w1b_ref[...], preferred_element_type=jnp.float32)
         + b1_ref[...])
    h = _gelu_exact(h)                                        # exact GELU
    s = jnp.dot(h, w2_ref[...], preferred_element_type=jnp.float32) + b2_ref[...]
    scaling_ref[...] = _sigmoid(s)                            # (B_ACC, C)


def se_apply_kernel(feats_ref, bidx_ref, scaling_ref, out_ref):
    """new_features = feats * scaling[batch_idx] (gather via one-hot matmul)."""
    tile = feats_ref.shape[0]
    b_pad = scaling_ref.shape[0]
    lanes = lax.broadcasted_iota(jnp.int32, (tile, b_pad), 1)
    onehot = (bidx_ref[...] == lanes).astype(scaling_ref.dtype)  # (tile, 128)
    gathered = jnp.dot(onehot, scaling_ref[...],
                       preferred_element_type=jnp.float32)       # (tile, C)
    out_ref[...] = (feats_ref[...] * gathered).astype(out_ref.dtype)


def minkowski_se_forward(feats, batch_idx, global_feature, global_weight, params):
    """PyTorch-equivalent forward. Returns the new voxel features (Nvox, C)."""
    out_dtype = feats.dtype
    feats = feats.astype(jnp.float32)
    n_vox, c = feats.shape
    b, g = global_feature.shape
    assert b <= _B_PAD, "batch size must be <= 128 for the one-hot gather"
    hid = params["w2"].shape[0]

    b_acc = max(_B_ALIGN, -(-b // _B_ALIGN) * _B_ALIGN)       # round_up(B, 8)
    chunk = _NCORES * _TILE
    n_pad = -(-n_vox // chunk) * chunk
    tiles = n_pad // _TILE
    tpc = tiles // _NCORES                                    # tiles per core

    feats_p = jnp.pad(feats, ((0, n_pad - n_vox), (0, 0)))
    bidx = jnp.pad(batch_idx.astype(jnp.int32), (0, n_pad - n_vox),
                   constant_values=-1)
    bidx_row = bidx.reshape(1, n_pad)       # lane-dense (pooling kernel)
    bidx_col = bidx.reshape(n_pad, 1)       # sublane-dense (apply kernel)
    glob_p = jnp.pad(global_feature.astype(jnp.float32),
                     ((0, b_acc - b), (0, 0)))
    gw = jnp.asarray(global_weight, jnp.float32).reshape(1)

    wg = params["wg"].astype(jnp.float32)                     # (glob_dim, C)
    bg = params["bg"].reshape(1, c).astype(jnp.float32)
    w1 = params["w1"].astype(jnp.float32)                     # (2C, C//r)
    w1a, w1b = w1[:c], w1[c:]
    b1 = params["b1"].reshape(1, hid).astype(jnp.float32)
    w2 = params["w2"].astype(jnp.float32)                     # (C//r, C)
    b2 = params["b2"].reshape(1, c).astype(jnp.float32)

    # ---- pass 1: per-core partial segment sums / counts ---------------------
    psum, pcnt = pl.pallas_call(
        se_pool_partial_kernel,
        out_shape=(jax.ShapeDtypeStruct((_NCORES, b_acc, c), jnp.float32),
                   jax.ShapeDtypeStruct((_NCORES, b_acc, 1), jnp.float32)),
        grid=(_NCORES, tpc),
        in_specs=[
            pl.BlockSpec((_TILE, c), lambda cc, t: (cc * tpc + t, 0)),
            pl.BlockSpec((1, _TILE), lambda cc, t: (0, cc * tpc + t)),
        ],
        out_specs=(pl.BlockSpec((None, b_acc, c), lambda cc, t: (cc, 0, 0)),
                   pl.BlockSpec((None, b_acc, 1), lambda cc, t: (cc, 0, 0))),
        compiler_params=pltpu.CompilerParams(
            dimension_semantics=("parallel", "arbitrary")),
    )(feats_p, bidx_row)

    # ---- pass 2: combine partials + SE MLP -> scaling table (B_ACC, C) ------
    scaling_small = pl.pallas_call(
        se_mlp_kernel,
        out_shape=jax.ShapeDtypeStruct((b_acc, c), jnp.float32),
        grid=(1,),
        in_specs=[
            pl.BlockSpec((_NCORES, b_acc, c), lambda i: (0, 0, 0)),
            pl.BlockSpec((_NCORES, b_acc, 1), lambda i: (0, 0, 0)),
            pl.BlockSpec((b_acc, g), lambda i: (0, 0)),               # glob
            pl.BlockSpec(memory_space=pltpu.MemorySpace.SMEM),        # weight
            pl.BlockSpec((g, c), lambda i: (0, 0)),                   # wg
            pl.BlockSpec((1, c), lambda i: (0, 0)),                   # bg
            pl.BlockSpec((c, hid), lambda i: (0, 0)),                 # w1a
            pl.BlockSpec((c, hid), lambda i: (0, 0)),                 # w1b
            pl.BlockSpec((1, hid), lambda i: (0, 0)),                 # b1
            pl.BlockSpec((hid, c), lambda i: (0, 0)),                 # w2
            pl.BlockSpec((1, c), lambda i: (0, 0)),                   # b2
        ],
        out_specs=pl.BlockSpec((b_acc, c), lambda i: (0, 0)),
    )(psum, pcnt, glob_p, gw, wg, bg, w1a, w1b, b1, w2, b2)

    # Re-pad the scaling rows to the 128-lane gather width (one-time host pad);
    # bf16 keeps the gather matmul single-pass on the MXU (one-hot exact in
    # bf16, sigmoid gate error <= 2^-9 relative).
    scaling = jnp.pad(scaling_small.astype(jnp.bfloat16),
                      ((0, _B_PAD - b_acc), (0, 0)))

    # ---- pass 3: per-voxel scaling (fully parallel over voxel tiles) --------
    out_p = pl.pallas_call(
        se_apply_kernel,
        out_shape=jax.ShapeDtypeStruct((n_pad, c), out_dtype),
        grid=(tiles,),
        in_specs=[
            pl.BlockSpec((_TILE, c), lambda t: (t, 0)),
            pl.BlockSpec((_TILE, 1), lambda t: (t, 0)),
            pl.BlockSpec((_B_PAD, c), lambda t: (0, 0)),  # resident scaling
        ],
        out_specs=pl.BlockSpec((_TILE, c), lambda t: (t, 0)),
        compiler_params=pltpu.CompilerParams(
            dimension_semantics=("parallel",)),
    )(feats_p, bidx_col, scaling)

    # TODO(synk): SparseTensor coordinate_manager / coordinate_map_key are
    # framework bookkeeping with no Pallas equivalent; only features returned.
    return out_p[:n_vox]


def minkowski_se_reference(feats, batch_idx, global_feature, global_weight,
                           params, num_batches):
    """Pure-JAX reference mirroring the PyTorch module."""
    hi = lax.Precision.HIGHEST
    f = feats.astype(jnp.float32)
    onehot = (batch_idx[:, None] == jnp.arange(num_batches)[None, :]
              ).astype(jnp.float32)                       # (Nvox, B)
    sums = jnp.matmul(onehot.T, f, precision=hi)          # (B, C)
    counts = jnp.sum(onehot, axis=0)[:, None]
    pooled = sums / counts                                # global avg pooling
    gt = jnp.matmul(global_feature.astype(jnp.float32), params["wg"],
                    precision=hi) + params["bg"]
    gt = global_weight * gt
    combined = jnp.concatenate([pooled, gt], axis=1)
    h = jnp.matmul(combined, params["w1"], precision=hi) + params["b1"]
    h = jax.nn.gelu(h, approximate=False)
    s = jnp.matmul(h, params["w2"], precision=hi) + params["b2"]
    scaling = jax.nn.sigmoid(s)
    return f * scaling[batch_idx]


if __name__ == "__main__":
    # Small shapes: batch=2, channels=128, glob_dim=64, reduction=16, 1000 voxels.
    B, C, G, R = 2, 128, 64, 16
    HID = C // R
    NVOX = 1000

    ks = jax.random.split(jax.random.PRNGKey(0), 8)
    batch_idx = jnp.arange(NVOX, dtype=jnp.int32) % B          # both batches populated
    feats = (jax.random.normal(ks[0], (NVOX, C), jnp.float32)
             + 0.5 * batch_idx[:, None].astype(jnp.float32))   # distinct per-batch means
    global_feature = jax.random.normal(ks[1], (B, G), jnp.float32)
    global_weight = 0.7

    params = {
        "wg": jax.random.normal(ks[2], (G, C), jnp.float32) / math.sqrt(G),
        "bg": 0.1 * jax.random.normal(ks[3], (C,), jnp.float32),
        "w1": jax.random.normal(ks[4], (2 * C, HID), jnp.float32) / math.sqrt(2 * C),
        "b1": 0.1 * jax.random.normal(ks[5], (HID,), jnp.float32),
        "w2": jax.random.normal(ks[6], (HID, C), jnp.float32) / math.sqrt(HID),
        "b2": 0.1 * jax.random.normal(ks[7], (C,), jnp.float32),
    }

    out = jax.block_until_ready(
        minkowski_se_forward(feats, batch_idx, global_feature, global_weight, params))
    ref = jax.block_until_ready(
        minkowski_se_reference(feats, batch_idx, global_feature, global_weight, params, B))

    assert out.shape == feats.shape and out.dtype == feats.dtype
    np.testing.assert_allclose(np.asarray(out), np.asarray(ref),
                               rtol=5e-3, atol=5e-3)
    print("KERNEL_OK")
</pallas_src>

<mosaic_0001>
module attributes {stable_mosaic.version = 11 : i64} {
  func.func @se_pool_partial_kernel(%arg0: i32, %arg1: i32, %arg2: memref<1024x128xf32, #tpu.memory_space<vmem>>, %arg3: memref<1x1024xi32, #tpu.memory_space<vmem>>, %arg4: memref<1x8x128xf32, #tpu.memory_space<vmem>>, %arg5: memref<1x8x1xf32, #tpu.memory_space<vmem>>) attributes {dimension_semantics = [#tpu.dimension_semantics<parallel>, #tpu.dimension_semantics<arbitrary>], iteration_bounds = array<i64: 2, 1>, scalar_prefetch = 0 : i64, scratch_operands = 0 : i64, tpu.core_type = #tpu.core_type<tc>, window_params = [{transform_indices = @transform_0, window_bounds = array<i64: 1024, 128>}, {transform_indices = @transform_1, window_bounds = array<i64: 1, 1024>}, {transform_indices = @transform_2, window_bounds = array<i64: 1, 8, 128>}, {transform_indices = @transform_3, window_bounds = array<i64: 1, 8, 1>}]} {
    %c0_i32 = arith.constant 0 : i32
    %0 = arith.cmpi eq, %arg1, %c0_i32 : i32
    %1 = arith.extui %0 : i1 to i32
    %c0_i32_0 = arith.constant 0 : i32
    %2 = arith.cmpi ne, %1, %c0_i32_0 : i32
    scf.if %2 {
      %cst_17 = arith.constant 0.000000e+00 : f32
      %25 = vector.broadcast %cst_17 : f32 to vector<8x128xf32>
      %c0_18 = arith.constant 0 : index
      %c0_19 = arith.constant 0 : index
      %c0_20 = arith.constant 0 : index
      %26 = vector.load %arg4[%c0_18, %c0_19, %c0_20] : memref<1x8x128xf32, #tpu.memory_space<vmem>>, vector<1x8x128xf32>
      %27 = vector.shape_cast %26 : vector<1x8x128xf32> to vector<8x128xf32>
      %28 = vector.shape_cast %25 : vector<8x128xf32> to vector<1x8x128xf32>
      tpu.vector_store %arg4[%c0_18, %c0_19, %c0_20], %28 {strides = array<i32>} : memref<1x8x128xf32, #tpu.memory_space<vmem>>, vector<1x8x128xf32>,
      %cst_21 = arith.constant 0.000000e+00 : f32
      %29 = vector.broadcast %cst_21 : f32 to vector<8x1xf32>
      %c0_22 = arith.constant 0 : index
      %c0_23 = arith.constant 0 : index
      %c0_24 = arith.constant 0 : index
      %30 = vector.load %arg5[%c0_22, %c0_23, %c0_24] : memref<1x8x1xf32, #tpu.memory_space<vmem>>, vector<1x8x1xf32>
      %31 = vector.shape_cast %30 : vector<1x8x1xf32> to vector<8x1xf32>
      %32 = vector.shape_cast %29 : vector<8x1xf32> to vector<1x8x1xf32>
      tpu.vector_store %arg5[%c0_22, %c0_23, %c0_24], %32 {strides = array<i32>} : memref<1x8x1xf32, #tpu.memory_space<vmem>>, vector<1x8x1xf32>,
    } else {
    }
    %c0 = arith.constant 0 : index
    %c0_1 = arith.constant 0 : index
    %3 = vector.load %arg2[%c0, %c0_1] : memref<1024x128xf32, #tpu.memory_space<vmem>>, vector<1024x128xf32>
    %4 = tpu.iota {dimensions = array<i32: 0>} : vector<8x1024xi32>
    %c0_2 = arith.constant 0 : index
    %c0_3 = arith.constant 0 : index
    %5 = vector.load %arg3[%c0_2, %c0_3] : memref<1x1024xi32, #tpu.memory_space<vmem>>, vector<1x1024xi32>
    %6 = vector.broadcast %5 : vector<1x1024xi32> to vector<8x1024xi32>
    %7 = arith.cmpi eq, %6, %4 : vector<8x1024xi32>
    %8 = arith.extui %7 : vector<8x1024xi1> to vector<8x1024xi32>
    %9 = arith.sitofp %8 : vector<8x1024xi32> to vector<8x1024xf32>
    %c0_4 = arith.constant 0 : index
    %c0_5 = arith.constant 0 : index
    %c0_6 = arith.constant 0 : index
    %10 = vector.load %arg4[%c0_4, %c0_5, %c0_6] : memref<1x8x128xf32, #tpu.memory_space<vmem>>, vector<1x8x128xf32>
    %11 = vector.shape_cast %10 : vector<1x8x128xf32> to vector<8x128xf32>
    %cst = arith.constant dense<0.000000e+00> : vector<8x128xf32>
    %12 = tpu.matmul %9, %3, %cst {dimension_numbers = #tpu.dot_dimension_numbers<[1], [0], [0], [1], [0, 0, 1, 1], [], []>} : vector<8x1024xf32>, vector<1024x128xf32>, vector<8x128xf32> -> vector<8x128xf32>
    %13 = arith.addf %11, %12 : vector<8x128xf32>
    %c0_7 = arith.constant 0 : index
    %c0_8 = arith.constant 0 : index
    %c0_9 = arith.constant 0 : index
    %14 = vector.load %arg4[%c0_7, %c0_8, %c0_9] : memref<1x8x128xf32, #tpu.memory_space<vmem>>, vector<1x8x128xf32>
    %15 = vector.shape_cast %14 : vector<1x8x128xf32> to vector<8x128xf32>
    %16 = vector.shape_cast %13 : vector<8x128xf32> to vector<1x8x128xf32>
    tpu.vector_store %arg4[%c0_7, %c0_8, %c0_9], %16 {strides = array<i32>} : memref<1x8x128xf32, #tpu.memory_space<vmem>>, vector<1x8x128xf32>,
    %c0_10 = arith.constant 0 : index
    %c0_11 = arith.constant 0 : index
    %c0_12 = arith.constant 0 : index
    %17 = vector.load %arg5[%c0_10, %c0_11, %c0_12] : memref<1x8x1xf32, #tpu.memory_space<vmem>>, vector<1x8x1xf32>
    %18 = vector.shape_cast %17 : vector<1x8x1xf32> to vector<8x1xf32>
    %cst_13 = arith.constant dense<0.000000e+00> : vector<8xf32>
    %19 = vector.multi_reduction <add>, %9, %cst_13 [1] : vector<8x1024xf32> to vector<8xf32>
    %20 = vector.shape_cast %19 : vector<8xf32> to vector<8x1xf32>
    %21 = arith.addf %18, %20 : vector<8x1xf32>
    %c0_14 = arith.constant 0 : index
    %c0_15 = arith.constant 0 : index
    %c0_16 = arith.constant 0 : index
    %22 = vector.load %arg5[%c0_14, %c0_15, %c0_16] : memref<1x8x1xf32, #tpu.memory_space<vmem>>, vector<1x8x1xf32>
    %23 = vector.shape_cast %22 : vector<1x8x1xf32> to vector<8x1xf32>
    %24 = vector.shape_cast %21 : vector<8x1xf32> to vector<1x8x1xf32>
    tpu.vector_store %arg5[%c0_14, %c0_15, %c0_16], %24 {strides = array<i32>} : memref<1x8x1xf32, #tpu.memory_space<vmem>>, vector<1x8x1xf32>,
    return
  }
  func.func @transform_0(%arg0: i32, %arg1: i32) -> (i32, i32) {
    %c1_i32 = arith.constant 1 : i32
    %0 = arith.muli %arg0, %c1_i32 : i32
    %1 = arith.addi %0, %arg1 : i32
    %c0_i32 = arith.constant 0 : i32
    %c0_i32_0 = arith.constant 0 : i32
    return %1, %c0_i32 : i32, i32
  }
  func.func @transform_1(%arg0: i32, %arg1: i32) -> (i32, i32) {
    %c1_i32 = arith.constant 1 : i32
    %0 = arith.muli %arg0, %c1_i32 : i32
    %1 = arith.addi %0, %arg1 : i32
    %c0_i32 = arith.constant 0 : i32
    %c0_i32_0 = arith.constant 0 : i32
    return %c0_i32, %1 : i32, i32
  }
  func.func @transform_2(%arg0: i32, %arg1: i32) -> (i32, i32, i32) {
    %c0_i32 = arith.constant 0 : i32
    %c0_i32_0 = arith.constant 0 : i32
    %c0_i32_1 = arith.constant 0 : i32
    return %arg0, %c0_i32, %c0_i32_0 : i32, i32, i32
  }
  func.func @transform_3(%arg0: i32, %arg1: i32) -> (i32, i32, i32) {
    %c0_i32 = arith.constant 0 : i32
    %c0_i32_0 = arith.constant 0 : i32
    %c0_i32_1 = arith.constant 0 : i32
    return %arg0, %c0_i32, %c0_i32_0 : i32, i32, i32
  }
}

</mosaic_0001>

<bundles_post_ra>
// kernel: tpu_custom_call.1
= control target key start
LH: loop header
LB: loop body
LE: loop exit
PB: predicated region body
PF: predicated region fallthrough
CT: control target
= control target key end

     0   :  { %s1716_s0 = inlined_call_operand.hbm [shape: f32[2048,128], index: 0, kind: input, shape index: {}]   ;;  %s1717_s1 = inlined_call_operand.hbm [shape: s32[1,2048], index: 1, kind: input, shape index: {}]   ;;  %s1718_s2 = inlined_call_operand.hbm [shape: f32[2,8,128], index: 2, kind: output, shape index: {0}]   ;;  %s1719_s3 = inlined_call_operand.vmem [shape: f32[2,8,1], index: 3, kind: output, shape index: {1}]  }
   0x1   :  { %1720 = sst [smem:[#allocation11_spill]] %s1716_s0 }
   0x2   :  { %9 = vsyncpa [#allocation3], 0 }
   0x3   :  { %11 = vsyncpa [#allocation3 + $0x1], 0 }
   0x4   :  { %12 = vsyncpa [#allocation6], 0 }
   0x5   :  { %14 = vsyncpa [#allocation6 + $0x1], 0 }
   0x6   :  { %15 = vsyncpa [#allocation4], 0 }
   0x7   :  { %17 = vsyncpa [#allocation4 + $0x1], 0  ;;  %s1315_s12 = smov 0   ;;  %s1317_s13 = smov 0  }
   0x8   :  { %s1319_s14 = smov 0   ;;  %s1321_s15 = smov 0  }
   0x9   :  { %s1323_s16 = smov 0   ;;  %s1325_s17 = smov 0  }
   0xa LB: > { %s898_s18 = sadd.s32 4294967295, %s1286_s17   ;;  %s899_s19 = sadd.s32 4294967294, %s1286_s17   ;;  %s1286_s17 = sphi %s1325_s17, %s23_s17   ;;  %s1282_s16 = sphi %s1323_s16, %s1733_s16   ;;  %s1278_s15 = sphi %s1321_s15, %s1732_s15   ;;  %s1274_s14 = sphi %s1319_s14, %s1731_s14   ;;  %s1270_s13 = sphi %s1317_s13, %s1730_s13   ;;  %s1266_s12 = sphi %s1315_s12, %s1729_s12  }
   0xb   : > { %s35_s20 = sadd.s32 1, %s1282_s16  ;;  %s44_s21 = sadd.s32 1, %s1274_s14 }
   0xc   : > { %p37_p0 = scmp.ge.s32.totalorder %s35_s20, 2  ;;  %p51_p1 = scmp.ne.s32.totalorder %s1274_s14, %s1270_s13 }
   0xd   : > { %p52_p2 = scmp.eq.s32.totalorder %s1286_s17, 0  ;;  %p57_p3 = scmp.ne.s32.totalorder %s1270_s13, %s1266_s12 }
   0xe   : > { %s1735_s20 = smov (%p37_p0, %s35_s20), 0  ;;  %p58_p5 = scmp.eq.s32.totalorder %s898_s18, 0 }
   0xf   : > { %p1356_p4 = por %p52_p2, %p51_p1  ;;  %s41_s23 = ssub.s32 %s1282_s16, %s1735_s20 }
  0x10   : > { %p109_p6 = scmp.eq.s32.totalorder %s898_s18, 1  ;;  %p42_p7 = scmp.eq.s32.totalorder %s41_s23, 0 }
  0x11   : > { %p1362_p8 = por %p58_p5, %p57_p3  ;;  %p115_p10 = scmp.eq.s32.totalorder %s899_s19, 1 }
  0x12   : > { %p1366_p9 = por %p109_p6, %p51_p1  ;;  %p1092_p13 = scmp.lt.s32.totalorder %s1286_s17, 2 }
  0x13   : > { %s1371_s26 = scalar_select %p42_p7, %s1274_s14, %s44_s21  }
  0x14   : > { %p1373_p11 = por %p115_p10, %p57_p3  ;;  %s1380_s28 = sand.u32 1, %s1274_s14  }
  0x15   : > { %s902_s29 = sshll.u32 %s1380_s28, 10  ;;  %s933_s30 = sshll.u32 %s1282_s16, 14 }
  0x16   : > { %s1725_s0 = sld [smem:[#allocation11_spill]]  ;;  %s165_s7 = scalar_lea.vmem [#allocation2], %s902_s29 }
  0x17   : > { %s173_s8 = sshll.u32 %s165_s7, 4  ;;  %p1389_p0 = pnand %p1092_p13, %p1356_p4  ;;  %s174_s8 = int_to_ptr.vmem [resolvable:$true] %s173_s8 }
  0x18   : > { %p908_p1 = scmp.ge.s32.totalorder %s1286_s17, 1  ;;  %s162_s10 = scalar_lea.sflag [#allocation3], %s1380_s28 }
  0x19   : > { %p1148_p2 = pneg %p1389_p0  ;;  %s1159_s11 = scalar_lea.vmem %s174_s8, 16384 }
  0x1a   : > { %p1160_p3 = scmp.ne.s32.totalorder %s174_s8, %s1159_s11  ;;  %s1288_s18 = smov [#allocation2]  }
  0x1b   : > { %s1164_s19 = sshll.u32 %s1288_s18, 4  ;;  %s1165_s19 = int_to_ptr.vmem [resolvable:$false] %s1164_s19 }
  0x1c   : > { %s172_s6 = scalar_lea.hbm %s1725_s0, %s933_s30  ;;  %p1162_p5 = pnand %p1160_p3, %p1148_p2 }
  0x1d   : > { %s1166_s21 = scalar_lea.vmem %s1165_s19, 32768  ;;  %p1167_p4 = scmp.lt.s32.totalorder %s174_s8, %s1165_s19 }
  0x1e   : > { %p1163_p6 = pneg %p1162_p5  ;;  %p1168_p7 = scmp.lt.s32.totalorder %s1166_s21, %s1159_s11 }
  0x20   : > { %p1169_p10 = por %p1168_p7, %p1167_p4 }
  0x22   : > { %p1170_p13 = pnand %p1169_p10, %p1163_p6 }
  0x24   : > { %1173 = shalt.err (!%p1170_p13)
}
  0x25   : > { %s1289_s22 = smov 128   ;;  %s1290_s23 = smov 8  }
  0x26   : > { %1084 = dma.hbm_to_vmem [thread:$0]  (!%p1389_p0), %s172_s6, 16384, %s174_s8, %s162_s10, %s1289_s22, %s1289_s22, %s1290_s23  }
  0x27   : > { %p201_p3 = scmp.lt.s32.totalorder %s1286_s17, 3  ;;  %s905_s29 = sshll.u32 %s1380_s28, 3 }
  0x28   : > { %s934_s30 = sshll.u32 %s1282_s16, 7  ;;  %s187_s18 = scalar_lea.vmem [#allocation5], %s905_s29 }
  0x29   : > { %p1407_p5 = pnand %p908_p1, %p201_p3  ;;  %s194_s11 = scalar_lea.hbm %s1717_s1, %s934_s30 }
  0x2a   : > { %s196_s19 = sshll.u32 %s187_s18, 4  ;;  %s184_s21 = scalar_lea.sflag [#allocation6], %s1380_s28  ;;  %s197_s19 = int_to_ptr.vmem [resolvable:$true] %s196_s19 }
  0x2b   : > { %s1187_s0 = scalar_lea.vmem %s197_s19, 128  ;;  %s1291_s6 = smov [#allocation5]  }
  0x2c   : > { %p1188_p6 = scmp.ne.s32.totalorder %s197_s19, %s1187_s0  ;;  %s1192_s8 = sshll.u32 %s1291_s6, 4  ;;  %s1193_s8 = int_to_ptr.vmem [resolvable:$false] %s1192_s8 }
  0x2d   : > { %s1194_s10 = scalar_lea.vmem %s1193_s8, 256  ;;  %p1195_p1 = scmp.lt.s32.totalorder %s197_s19, %s1193_s8 }
  0x2e   : > { %p1190_p4 = pnand %p1188_p6, %p1148_p2  ;;  %p1196_p10 = scmp.lt.s32.totalorder %s1194_s10, %s1187_s0 }
  0x30   : > { %p1191_p7 = pneg %p1190_p4  ;;  %p1197_p13 = por %p1196_p10, %p1195_p1 }
  0x32   : > { %p1198_p3 = pnand %p1197_p13, %p1191_p7 }
  0x34   : > { %1201 = shalt.err (!%p1198_p3)
}
  0x35   : > { %1087 = dma.hbm_to_vmem [thread:$0]  (!%p1389_p0), %s194_s11, 128, %s197_s19, %s184_s21  }
  0x36   : > { %205 = sbr.rel (%p1407_p5) target bundleno = 346 (0x15a), region = 28  ;;  %s1423_s28 = sand.u32 (!%p1407_p5), 1, %s1270_s13  }
  0x37   : > { %s909_s22 = sshll.u32 (!%p1407_p5), %s1423_s28, 10  ;;  %s208_s23 = scalar_lea.sflag (!%p1407_p5), [#allocation3], %s1423_s28 }
  0x38   : > { %s1427_s29 = scalar_lea.vmem (!%p1407_p5), [#allocation2], %s909_s22 }
  0x3b   : > { %1253 = dma.done.wait (%p1362_p8), %s208_s23, 16384  }
  0x3c   : > { %1255 = vsyncadd (%p1362_p8), %s208_s23, 4294950912  ;;  %s910_s0 = sshll.u32 %s1423_s28, 3  ;;  %s217_s9 = scalar_lea.sflag [#allocation6], %s1423_s28 }
  0x3d   : > { %s1437_s30 = scalar_lea.vmem [#allocation5], %s910_s0 }
  0x3e   : > { %1257 = dma.done.wait (%p1362_p8), %s217_s9, 128  }
  0x3f   : > { %1259 = vsyncadd (%p1362_p8), %s217_s9, 4294967168  ;;  %v298_v0 = vld [vmem:[%s1427_s29 + $0xf8] sm:$0xff]  ;;  %v297_v4 = vld [vmem:[%s1427_s29 + $0xf0] sm:$0xff]  ;;  %v395_v32 = vlaneseq  ;;  %p256_p8 = scmp.lt.s32.totalorder %s1278_s15, 1  ;;  %vm265_vm8 = vcmask 7168   ;;  %s930_s18 = sshll.u32 %s1278_s15, 7 }
  0x40   : > { %v330_v1 = vld [vmem:[%s1427_s29 + $0x1f8] sm:$0xff]  ;;  %935 = vmatprep.subr.mxu0 %v298_v0  ;;  %v329_v5 = vld [vmem:[%s1427_s29 + $0x1f0] sm:$0xff]  ;;  %v296_v8 = vld [vmem:[%s1427_s29 + $0xe8] sm:$0xff]  ;;  %s245_s19 = scalar_lea.vmem [#allocation7], %s910_s0  ;;  %s766_s10 = scalar_lea.hbm %s1718_s2, %s930_s18 }
  0x41   : > { %v282_v2 = vld [vmem:[%s1427_s29 + $0x78] sm:$0xff]  ;;  %970 = vmatprep.subr.mxu1 %v330_v1  ;;  %v281_v6 = vld [vmem:[%s1427_s29 + $0x70] sm:$0xff]  ;;  %v328_v9 = vld [vmem:[%s1427_s29 + $0x1e8] sm:$0xff]  ;;  %v1483_v41 = vshrl.u32 %v395_v32, 7  ;;  %s257_s24 = scalar_select %p256_p8, %s1278_s15, 1 }
  0x42   : > { %v314_v3 = vld [vmem:[%s1427_s29 + $0x178] sm:$0xff]  ;;  %936 = vmatpush3.msra.mxu0 %v282_v2  ;;  %v313_v7 = vld [vmem:[%s1427_s29 + $0x170] sm:$0xff]  ;;  %v280_v10 = vld [vmem:[%s1427_s29 + $0x68] sm:$0xff]  ;;  %s768_s21 = sshll.u32 %s245_s19, 4  ;;  %s751_s22 = scalar_lea.sflag [#allocation4], %s1423_s28  ;;  %s769_s21 = int_to_ptr.vmem [resolvable:$true] %s768_s21 }
  0x43   : > { %971 = vmatpush3.msra.mxu1 %v314_v3  ;;  %937 = vmatprep.subr.mxu0 %v297_v4  ;;  %v312_v11 = vld [vmem:[%s1427_s29 + $0x168] sm:$0xff]  ;;  %v295_v12 = vld [vmem:[%s1427_s29 + $0xe0] sm:$0xff]  ;;  %v294_v16 = vld [vmem:[%s1427_s29 + $0xd8] sm:$0xff]  ;;  %v404_v50 = vsub.s32 1, %v1483_v41  ;;  %v412_v54 = vsub.s32 3, %v1483_v41  ;;  %v400_v57 = vsub.s32 0, %v1483_v41 }
  0x44   : > { %972 = vmatprep.subr.mxu1 %v329_v5  ;;  %938 = vmatpush3.msra.mxu0 %v281_v6  ;;  %v327_v13 = vld [vmem:[%s1427_s29 + $0x1e0] sm:$0xff]  ;;  %v326_v17 = vld [vmem:[%s1427_s29 + $0x1d8] sm:$0xff]  ;;  %v293_v20 = vld [vmem:[%s1427_s29 + $0xd0] sm:$0xff]  ;;  %v408_v58 = vsub.s32 2, %v1483_v41  ;;  %s912_s4 = sshll.u32 %s257_s24, 3  ;;  %s1202_s23 = scalar_lea.vmem %s769_s21, 128 }
  0x45   : > { %973 = vmatpush3.msra.mxu1 %v313_v7  ;;  %939 = vmatprep.subr.mxu0 %v296_v8  ;;  %v279_v14 = vld [vmem:[%s1427_s29 + $0x60] sm:$0xff]  ;;  %v278_v18 = vld [vmem:[%s1427_s29 + $0x58] sm:$0xff]  ;;  %v325_v21 = vld [vmem:[%s1427_s29 + $0x1d0] sm:$0xff]  ;;  %s259_s11 = scalar_lea.vmem %s1719_s3, %s912_s4  ;;  %p1203_p0 = scmp.ne.s32.totalorder %s769_s21, %s1202_s23 }
  0x46   : > { %974 = vmatprep.subr.mxu1 %v328_v9  ;;  %v311_v15 = vld [vmem:[%s1427_s29 + $0x160] sm:$0xff]  ;;  %940 = vmatpush3.msra.mxu0 %v280_v10  ;;  %v310_v19 = vld [vmem:[%s1427_s29 + $0x158] sm:$0xff]  ;;  %v277_v22 = vld [vmem:[%s1427_s29 + $0x50] sm:$0xff] }
  0x47   : > { %975 = vmatpush3.msra.mxu1 %v312_v11  ;;  %941 = vmatprep.subr.mxu0 %v295_v12  ;;  %v309_v23 = vld [vmem:[%s1427_s29 + $0x150] sm:$0xff]  ;;  %v292_v24 = vld [vmem:[%s1427_s29 + $0xc8] sm:$0xff]  ;;  %v291_v28 = vld [vmem:[%s1427_s29 + $0xc0] sm:$0xff]  ;;  %v1292_v11 = vmov 1.0   ;;  %p1204_p2 = pnand %p1203_p0, %p1366_p9 }
  0x48   : > { %976 = vmatprep.subr.mxu1 %v327_v13  ;;  %942 = vmatpush3.msra.mxu0 %v279_v14  ;;  %v324_v25 = vld [vmem:[%s1427_s29 + $0x1c8] sm:$0xff]  ;;  %v323_v29 = vld [vmem:[%s1427_s29 + $0x1c0] sm:$0xff]  ;;  %v290_v33 = vld [vmem:[%s1427_s29 + $0xb8] sm:$0xff] }
  0x49   : > { %977 = vmatpush3.msra.mxu1 %v311_v15  ;;  %943 = vmatprep.subr.mxu0 %v294_v16  ;;  %v276_v26 = vld [vmem:[%s1427_s29 + $0x48] sm:$0xff]  ;;  %v275_v30 = vld [vmem:[%s1427_s29 + $0x40] sm:$0xff]  ;;  %v322_v34 = vld [vmem:[%s1427_s29 + $0x1b8] sm:$0xff]  ;;  %p1205_p5 = pneg %p1204_p2 }
  0x4a   : > { %978 = vmatprep.subr.mxu1 %v326_v17  ;;  %944 = vmatpush3.msra.mxu0 %v278_v18  ;;  %v308_v27 = vld [vmem:[%s1427_s29 + $0x148] sm:$0xff]  ;;  %v307_v31 = vld [vmem:[%s1427_s29 + $0x140] sm:$0xff]  ;;  %v274_v35 = vld [vmem:[%s1427_s29 + $0x38] sm:$0xff] }
  0x4b   : > { %979 = vmatpush3.msra.mxu1 %v310_v19  ;;  %945 = vmatprep.subr.mxu0 %v293_v20  ;;  %v306_v36 = vld [vmem:[%s1427_s29 + $0x138] sm:$0xff]  ;;  %v289_v37 = vld [vmem:[%s1427_s29 + $0xb0] sm:$0xff]  ;;  %v288_v42 = vld [vmem:[%s1427_s29 + $0xa8] sm:$0xff] }
  0x4c   : > { %980 = vmatprep.subr.mxu1 %v325_v21  ;;  %946 = vmatpush3.msra.mxu0 %v277_v22  ;;  %v321_v38 = vld [vmem:[%s1427_s29 + $0x1b0] sm:$0xff]  ;;  %v320_v43 = vld [vmem:[%s1427_s29 + $0x1a8] sm:$0xff]  ;;  %v287_v46 = vld [vmem:[%s1427_s29 + $0xa0] sm:$0xff] }
  0x4d   : > { %981 = vmatpush3.msra.mxu1 %v309_v23  ;;  %947 = vmatprep.subr.mxu0 %v292_v24  ;;  %v273_v39 = vld [vmem:[%s1427_s29 + $0x30] sm:$0xff]  ;;  %v272_v44 = vld [vmem:[%s1427_s29 + $0x28] sm:$0xff]  ;;  %v319_v47 = vld [vmem:[%s1427_s29 + $0x1a0] sm:$0xff]  ;;  %v1293_v24 = vmov 0.0  }
  0x4e   : > { %982 = vmatprep.subr.mxu1 %v324_v25  ;;  %948 = vmatpush3.msra.mxu0 %v276_v26  ;;  %v305_v40 = vld [vmem:[%s1427_s29 + $0x130] sm:$0xff]  ;;  %v304_v45 = vld [vmem:[%s1427_s29 + $0x128] sm:$0xff]  ;;  %v271_v48 = vld [vmem:[%s1427_s29 + $0x20] sm:$0xff]  ;;  %266 = vst.msk [vmem:[%s259_s11] sm:$0xff] %vm265_vm8, %v1293_v24 }
  0x4f   : > { %983 = vmatpush3.msra.mxu1 %v308_v27  ;;  %949 = vmatprep.subr.mxu0 %v291_v28  ;;  %v303_v49 = vld [vmem:[%s1427_s29 + $0x120] sm:$0xff]  ;;  %v286_v51 = vld [vmem:[%s1427_s29 + $0x98] sm:$0xff]  ;;  %v285_v59 = vld [vmem:[%s1427_s29 + $0x90] sm:$0xff] }
  0x50   : > { %984 = vmatprep.subr.mxu1 %v323_v29  ;;  %950 = vmatpush3.msra.mxu0 %v275_v30  ;;  %v318_v52 = vld [vmem:[%s1427_s29 + $0x198] sm:$0xff]  ;;  %v1497_v53 = vld [vmem:[%s1437_s30] sm:$0xff]  ;;  %v317_v60 = vld [vmem:[%s1427_s29 + $0x190] sm:$0xff] }
  0x51   : > { %985 = vmatpush3.msra.mxu1 %v307_v31  ;;  %951 = vmatprep.subr.mxu0 %v290_v33  ;;  %v270_v55 = vld [vmem:[%s1427_s29 + $0x18] sm:$0xff]  ;;  %v269_v61 = vld [vmem:[%s1427_s29 + $0x10] sm:$0xff]  ;;  %v405_v63 = vrot.slane %v1497_v53, %v404_v50  ;;  %v284_v0 = vld [vmem:[%s1427_s29 + $0x88] sm:$0xff]  ;;  %v1512_v2 = vrot.slane %v1497_v53, %v412_v54  ;;  %v401_v5 = vrot.slane %v1497_v53, %v400_v57 }
  0x52   : > { %986 = vmatprep.subr.mxu1 %v322_v34  ;;  %952 = vmatpush3.msra.mxu0 %v274_v35  ;;  %v302_v56 = vld [vmem:[%s1427_s29 + $0x118] sm:$0xff]  ;;  %v301_v62 = vld [vmem:[%s1427_s29 + $0x110] sm:$0xff]  ;;  %v316_v1 = vld [vmem:[%s1427_s29 + $0x188] sm:$0xff]  ;;  %v1518_v6 = vrot.slane %v1497_v53, %v408_v58  ;;  %v416_v34 = vsub.s32 4, %v1483_v41 }
  0x53   : > { %987 = vmatpush3.msra.mxu1 %v306_v36  ;;  %953 = vmatprep.subr.mxu0 %v289_v37  ;;  %v268_v3 = vld [vmem:[%s1427_s29 + $0x8] sm:$0xff]  ;;  %v283_v7 = vld [vmem:[%s1427_s29 + $0x80] sm:$0xff]  ;;  %vm431_vm0 = vcmp.eq.s32.totalorder %v405_v63, %v1483_v41  ;;  %vm433_vm1 = vcmp.eq.s32.totalorder %v1512_v2, %v1483_v41  ;;  %vm430_vm2 = vcmp.eq.s32.totalorder %v401_v5, %v1483_v41  ;;  %v362_v12 = vld [vmem:[%s1427_s29 + $0x2f8] sm:$0xff] }
  0x54   : > { %988 = vmatprep.subr.mxu1 %v321_v38  ;;  %954 = vmatpush3.msra.mxu0 %v273_v39  ;;  %v300_v4 = vld [vmem:[%s1427_s29 + $0x108] sm:$0xff]  ;;  %v315_v8 = vld [vmem:[%s1427_s29 + $0x180] sm:$0xff]  ;;  %vm432_vm3 = vcmp.eq.s32.totalorder %v1518_v6, %v1483_v41  ;;  %v394_v13 = vld [vmem:[%s1427_s29 + $0x3f8] sm:$0xff]  ;;  %v913_v25 = vsel %vm430_vm2, 1.0, %v1293_v24  ;;  %v914_v26 = vsel %vm431_vm0, 1.0, %v1293_v24  ;;  %v916_v50 = vsel %vm433_vm1, 1.0, %v1293_v24 }
  0x55   : > { %989 = vmatpush3.msra.mxu1 %v305_v40  ;;  %955 = vmatprep.subr.mxu0 %v288_v42  ;;  %v267_v9 = vld [vmem:[%s1427_s29] sm:$0xff]  ;;  %v346_v14 = vld [vmem:[%s1427_s29 + $0x278] sm:$0xff]  ;;  %v361_v16 = vld [vmem:[%s1427_s29 + $0x2f0] sm:$0xff]  ;;  %v738_v33 = vadd.f32 %v914_v26, %v913_v25  ;;  %v915_v37 = vsel %vm432_vm3, 1.0, %v1293_v24 }
  0x56   : > { %990 = vmatprep.subr.mxu1 %v320_v43  ;;  %956 = vmatpush3.msra.mxu0 %v272_v44  ;;  %v299_v10 = vld [vmem:[%s1427_s29 + $0x100] sm:$0xff]  ;;  %v378_v15 = vld [vmem:[%s1427_s29 + $0x378] sm:$0xff]  ;;  %v393_v17 = vld [vmem:[%s1427_s29 + $0x3f0] sm:$0xff] }
  0x57   : > { %991 = vmatpush3.msra.mxu1 %v304_v45  ;;  %957 = vmatprep.subr.mxu0 %v287_v46  ;;  %v345_v18 = vld [vmem:[%s1427_s29 + $0x270] sm:$0xff]  ;;  %v360_v20 = vld [vmem:[%s1427_s29 + $0x2e8] sm:$0xff]  ;;  %v359_v27 = vld [vmem:[%s1427_s29 + $0x2e0] sm:$0xff]  ;;  %v1582_v45 = vrot.slane %v1497_v53, %v416_v34  ;;  %v739_v46 = vadd.f32 %v915_v37, %v738_v33 }
  0x58   : > { %992 = vmatprep.subr.mxu1 %v319_v47  ;;  %958 = vmatpush3.msra.mxu0 %v271_v48  ;;  %v377_v19 = vld [vmem:[%s1427_s29 + $0x370] sm:$0xff]  ;;  %v392_v21 = vld [vmem:[%s1427_s29 + $0x3e8] sm:$0xff]  ;;  %v391_v28 = vld [vmem:[%s1427_s29 + $0x3e0] sm:$0xff] }
  0x59   : > { %993 = vmatpush3.msra.mxu1 %v303_v49  ;;  %959 = vmatprep.subr.mxu0 %v286_v51  ;;  %v344_v22 = vld [vmem:[%s1427_s29 + $0x268] sm:$0xff]  ;;  %v343_v29 = vld [vmem:[%s1427_s29 + $0x260] sm:$0xff]  ;;  %v358_v31 = vld [vmem:[%s1427_s29 + $0x2d8] sm:$0xff]  ;;  %v420_v49 = vsub.s32 5, %v1483_v41  ;;  %vm434_vm4 = vcmp.eq.s32.totalorder %v1582_v45, %v1483_v41  ;;  %v740_v58 = vadd.f32 %v916_v50, %v739_v46 }
  0x5a   : > { %994 = vmatprep.subr.mxu1 %v318_v52  ;;  %960 = vmatpush3.msra.mxu0 %v270_v55  ;;  %v376_v23 = vld [vmem:[%s1427_s29 + $0x368] sm:$0xff]  ;;  %v375_v30 = vld [vmem:[%s1427_s29 + $0x360] sm:$0xff]  ;;  %v390_v32 = vld [vmem:[%s1427_s29 + $0x3d8] sm:$0xff]  ;;  %v917_v63 = vsel %vm434_vm4, 1.0, %v1293_v24 }
  0x5b   : > { %995 = vmatpush3.msra.mxu1 %v302_v56  ;;  %961 = vmatprep.subr.mxu0 %v285_v59  ;;  %v342_v35 = vld [vmem:[%s1427_s29 + $0x258] sm:$0xff]  ;;  %v357_v38 = vld [vmem:[%s1427_s29 + $0x2d0] sm:$0xff]  ;;  %v356_v43 = vld [vmem:[%s1427_s29 + $0x2c8] sm:$0xff]  ;;  %v741_v6 = vadd.f32 %v917_v63, %v740_v58 }
  0x5c   : > { %996 = vmatprep.subr.mxu1 %v317_v60  ;;  %962 = vmatpush3.msra.mxu0 %v269_v61  ;;  %v374_v36 = vld [vmem:[%s1427_s29 + $0x358] sm:$0xff]  ;;  %v389_v39 = vld [vmem:[%s1427_s29 + $0x3d0] sm:$0xff]  ;;  %v388_v44 = vld [vmem:[%s1427_s29 + $0x3c8] sm:$0xff]  ;;  %v1602_v61 = vrot.slane %v1497_v53, %v420_v49 }
  0x5d   : > { %997 = vmatpush3.msra.mxu1 %v301_v62  ;;  %963 = vmatprep.subr.mxu0 %v284_v0  ;;  %v341_v40 = vld [vmem:[%s1427_s29 + $0x250] sm:$0xff]  ;;  %v340_v47 = vld [vmem:[%s1427_s29 + $0x248] sm:$0xff]  ;;  %v355_v51 = vld [vmem:[%s1427_s29 + $0x2c0] sm:$0xff]  ;;  %v424_v62 = vsub.s32 6, %v1483_v41 }
  0x5e   : > { %998 = vmatprep.subr.mxu1 %v316_v1  ;;  %964 = vmatpush3.msra.mxu0 %v268_v3  ;;  %v373_v42 = vld [vmem:[%s1427_s29 + $0x350] sm:$0xff]  ;;  %v372_v48 = vld [vmem:[%s1427_s29 + $0x348] sm:$0xff]  ;;  %v387_v52 = vld [vmem:[%s1427_s29 + $0x3c0] sm:$0xff]  ;;  %vm435_vm5 = vcmp.eq.s32.totalorder %v1602_v61, %v1483_v41 }
  0x5f   : > { %999 = vmatpush3.msra.mxu1 %v300_v4  ;;  %965 = vmatprep.subr.mxu0 %v283_v7  ;;  %v339_v54 = vld [vmem:[%s1427_s29 + $0x240] sm:$0xff]  ;;  %v354_v56 = vld [vmem:[%s1427_s29 + $0x2b8] sm:$0xff]  ;;  %v353_v0 = vld [vmem:[%s1427_s29 + $0x2b0] sm:$0xff] }
  0x60   : > { %1000 = vmatprep.subr.mxu1 %v315_v8  ;;  %966 = vmatpush3.msra.mxu0 %v267_v9  ;;  %v371_v55 = vld [vmem:[%s1427_s29 + $0x340] sm:$0xff]  ;;  %v386_v57 = vld [vmem:[%s1427_s29 + $0x3b8] sm:$0xff]  ;;  %v385_v1 = vld [vmem:[%s1427_s29 + $0x3b0] sm:$0xff]  ;;  %v428_v9 = vsub.s32 7, %v1483_v41 }
  0x61   : > { %921 = vmatprep.mubr.msk.f32.mxu0 %vm431_vm0, %v1292_v11  ;;  %1001 = vmatpush3.msra.mxu1 %v299_v10  ;;  %v338_v59 = vld [vmem:[%s1427_s29 + $0x238] sm:$0xff]  ;;  %v337_v2 = vld [vmem:[%s1427_s29 + $0x230] sm:$0xff]  ;;  %v352_v4 = vld [vmem:[%s1427_s29 + $0x2a8] sm:$0xff]  ;;  %v425_v10 = vrot.slane %v1497_v53, %v424_v62 }
  0x62   : > { %923 = vmatprep.mubr.msk.f32.mxu1 %vm433_vm1, %v1292_v11  ;;  %922 = vmatmul.mubr.msk.f32.vlgmr.msra.gmra.mxu0 %vm430_vm2, %v1292_v11  ;;  %v370_v60 = vld [vmem:[%s1427_s29 + $0x338] sm:$0xff]  ;;  %v369_v3 = vld [vmem:[%s1427_s29 + $0x330] sm:$0xff]  ;;  %v384_v5 = vld [vmem:[%s1427_s29 + $0x3a8] sm:$0xff] }
  0x63   : > { %924 = vmatmul.mubr.msk.f32.vlgmr.msra.gmra.mxu1 %vm432_vm3, %v1292_v11  ;;  %1005 = vmatprep.subr.mxu0 %v362_v12  ;;  %v336_v7 = vld [vmem:[%s1427_s29 + $0x228] sm:$0xff]  ;;  %v351_v12 = vld [vmem:[%s1427_s29 + $0x2a0] sm:$0xff]  ;;  %vm436_vm6 = vcmp.eq.s32.totalorder %v425_v10, %v1483_v41  ;;  %v381_v25 = vld [vmem:[%s1427_s29 + $0x390] sm:$0xff] }
  0x64   : > { %1040 = vmatprep.subr.mxu1 %v394_v13  ;;  %1006 = vmatpush3.msra.mxu0 %v346_v14  ;;  %v368_v8 = vld [vmem:[%s1427_s29 + $0x328] sm:$0xff]  ;;  %v383_v13 = vld [vmem:[%s1427_s29 + $0x3a0] sm:$0xff]  ;;  %v918_v14 = vsel %vm435_vm5, 1.0, %v1293_v24  ;;  %v919_v26 = vsel %vm436_vm6, 1.0, %v1293_v24 }
  0x65   : > { %1041 = vmatpush3.msra.mxu1 %v378_v15  ;;  %1007 = vmatprep.subr.mxu0 %v361_v16  ;;  %v335_v15 = vld [vmem:[%s1427_s29 + $0x220] sm:$0xff] }
  0x66   : > { %1042 = vmatprep.subr.mxu1 %v393_v17  ;;  %1008 = vmatpush3.msra.mxu0 %v345_v18  ;;  %v367_v16 = vld [vmem:[%s1427_s29 + $0x320] sm:$0xff]  ;;  %v350_v17 = vld [vmem:[%s1427_s29 + $0x298] sm:$0xff] }
  0x67   : > { %1043 = vmatpush3.msra.mxu1 %v377_v19  ;;  %1009 = vmatprep.subr.mxu0 %v360_v20  ;;  %v382_v18 = vld [vmem:[%s1427_s29 + $0x398] sm:$0xff]  ;;  %v347_v33 = vld [vmem:[%s1427_s29 + $0x280] sm:$0xff] }
  0x68   : > { %1044 = vmatprep.subr.mxu1 %v392_v21  ;;  %1010 = vmatpush3.msra.mxu0 %v344_v22  ;;  %v334_v19 = vld [vmem:[%s1427_s29 + $0x218] sm:$0xff]  ;;  %v429_v21 = vrot.slane %v1497_v53, %v428_v9  ;;  %v742_v22 = vadd.f32 %v918_v14, %v741_v6  ;;  %v348_v53 = vld [vmem:[%s1427_s29 + $0x288] sm:$0xff]  ;;  %v379_v34 = vld [vmem:[%s1427_s29 + $0x380] sm:$0xff] }
  0x69   : > { %1045 = vmatpush3.msra.mxu1 %v376_v23  ;;  %1011 = vmatprep.subr.mxu0 %v359_v27  ;;  %v366_v20 = vld [vmem:[%s1427_s29 + $0x318] sm:$0xff]  ;;  %v349_v23 = vld [vmem:[%s1427_s29 + $0x290] sm:$0xff]  ;;  %v363_v37 = vld [vmem:[%s1427_s29 + $0x300] sm:$0xff] }
  0x6a   : > { %1046 = vmatprep.subr.mxu1 %v391_v28  ;;  %1012 = vmatpush3.msra.mxu0 %v343_v29  ;;  %v333_v27 = vld [vmem:[%s1427_s29 + $0x210] sm:$0xff]  ;;  %v380_v29 = vld [vmem:[%s1427_s29 + $0x388] sm:$0xff]  ;;  %vm437_vm7 = vcmp.eq.s32.totalorder %v429_v21, %v1483_v41 }
  0x6b   : > { %1047 = vmatpush3.msra.mxu1 %v375_v30  ;;  %1013 = vmatprep.subr.mxu0 %v358_v31  ;;  %v365_v28 = vld [vmem:[%s1427_s29 + $0x310] sm:$0xff]  ;;  %v332_v30 = vld [vmem:[%s1427_s29 + $0x208] sm:$0xff] }
  0x6c   : > { %1048 = vmatprep.subr.mxu1 %v390_v32  ;;  %1014 = vmatpush3.msra.mxu0 %v342_v35  ;;  %v364_v31 = vld [vmem:[%s1427_s29 + $0x308] sm:$0xff]  ;;  %v743_v32 = vadd.f32 %v919_v26, %v742_v22  ;;  %v920_v35 = vsel %vm437_vm7, 1.0, %v1293_v24 }
  0x6d   : > { %1049 = vmatpush3.msra.mxu1 %v374_v36  ;;  %1015 = vmatprep.subr.mxu0 %v357_v38  ;;  %v331_v36 = vld [vmem:[%s1427_s29 + $0x200] sm:$0xff]  ;;  %s1294_s29 = smov [#allocation7]  }
  0x6e   : > { %1050 = vmatprep.subr.mxu1 %v389_v39  ;;  %1016 = vmatpush3.msra.mxu0 %v341_v40  ;;  %v744_v38 = vadd.f32 %v920_v35, %v743_v32  ;;  %v737_v39 = vld [vmem:[%s259_s11] sm:$0xff]  ;;  %s1206_s9 = sshll.u32 %s1294_s29, 4  ;;  %s1207_s9 = int_to_ptr.vmem [resolvable:$false] %s1206_s9 }
  0x6f   : > { %1051 = vmatpush3.msra.mxu1 %v373_v42  ;;  %1017 = vmatprep.subr.mxu0 %v356_v43  ;;  %s1208_s15 = scalar_lea.vmem %s1207_s9, 256  ;;  %p1209_p6 = scmp.lt.s32.totalorder %s769_s21, %s1207_s9 }
  0x70   : > { %1052 = vmatprep.subr.mxu1 %v388_v44  ;;  %1018 = vmatpush3.msra.mxu0 %v340_v47  ;;  %p1210_p4 = scmp.lt.s32.totalorder %s1208_s15, %s1202_s23 }
  0x71   : > { %1053 = vmatpush3.msra.mxu1 %v372_v48  ;;  %1019 = vmatprep.subr.mxu0 %v355_v51 }
  0x72   : > { %1054 = vmatprep.subr.mxu1 %v387_v52  ;;  %1020 = vmatpush3.msra.mxu0 %v339_v54  ;;  %p1211_p7 = por %p1210_p4, %p1209_p6 }
  0x73   : > { %1055 = vmatpush3.msra.mxu1 %v371_v55  ;;  %1021 = vmatprep.subr.mxu0 %v354_v56 }
  0x74   : > { %1056 = vmatprep.subr.mxu1 %v386_v57  ;;  %1022 = vmatpush3.msra.mxu0 %v338_v59  ;;  %p1212_p1 = pnand %p1211_p7, %p1205_p5 }
  0x75   : > { %1057 = vmatpush3.msra.mxu1 %v370_v60  ;;  %1023 = vmatprep.subr.mxu0 %v353_v0 }
  0x76   : > { %1058 = vmatprep.subr.mxu1 %v385_v1  ;;  %1024 = vmatpush3.msra.mxu0 %v337_v2 }
  0x77   : > { %1059 = vmatpush3.msra.mxu1 %v369_v3  ;;  %1025 = vmatprep.subr.mxu0 %v352_v4 }
  0x78   : > { %1060 = vmatprep.subr.mxu1 %v384_v5  ;;  %1026 = vmatpush3.msra.mxu0 %v336_v7 }
  0x79   : > { %1061 = vmatpush3.msra.mxu1 %v368_v8  ;;  %1027 = vmatprep.subr.mxu0 %v351_v12 }
  0x7a   : > { %1062 = vmatprep.subr.mxu1 %v383_v13  ;;  %1028 = vmatpush3.msra.mxu0 %v335_v15 }
  0x7b   : > { %1063 = vmatpush3.msra.mxu1 %v367_v16  ;;  %1029 = vmatprep.subr.mxu0 %v350_v17 }
  0x7c   : > { %1064 = vmatprep.subr.mxu1 %v382_v18  ;;  %1030 = vmatpush3.msra.mxu0 %v334_v19 }
  0x7d   : > { %1065 = vmatpush3.msra.mxu1 %v366_v20  ;;  %1031 = vmatprep.subr.mxu0 %v349_v23 }
  0x7e   : > { %1066 = vmatprep.subr.mxu1 %v381_v25  ;;  %1032 = vmatpush3.msra.mxu0 %v333_v27 }
  0x7f   : > { %1067 = vmatpush3.msra.mxu1 %v365_v28  ;;  %1033 = vmatprep.subr.mxu0 %v348_v53 }
  0x80   : > { %1068 = vmatprep.subr.mxu1 %v380_v29  ;;  %1034 = vmatpush3.msra.mxu0 %v332_v30 }
  0x81   : > { %1069 = vmatpush3.msra.mxu1 %v364_v31  ;;  %1035 = vmatprep.subr.mxu0 %v347_v33 }
  0x82   : > { %1070 = vmatprep.subr.mxu1 %v379_v34  ;;  %1036 = vmatpush3.msra.mxu0 %v331_v36 }
  0x83   : > { %925 = vmatprep.mubr.msk.f32.mxu0 %vm435_vm5, %v1292_v11  ;;  %1071 = vmatpush3.msra.mxu1 %v363_v37 }
  0x84   : > { %927 = vmatprep.mubr.msk.f32.mxu1 %vm437_vm7, %v1292_v11  ;;  %926 = vmatmul.mubr.msk.f32.vlgmr.msra.gmra.mxu0 %vm434_vm4, %v1292_v11 }
  0x85   : > { %928 = vmatmul.mubr.msk.f32.vlgmr.msra.gmra.mxu1 %vm436_vm6, %v1292_v11  ;;  %745 = vadd.xlane.f32.xlu0 %v744_v38 }
 0x10e   : > { %v746_v40 = vpop.xlane.xlu0 %745 }
 0x10f   : > { %v747_v42 = vadd.f32 %v746_v40, %v737_v39 }
 0x111   : > { %749 = vst.msk [vmem:[%s259_s11] sm:$0xff] %vm265_vm8, %v747_v42 }
 0x122   : > { %v967_v43 = vpop.f32.mrf.mxu0 }
 0x123   : > { %v1002_v41 = vpop.f32.mrf.mxu1 }
 0x124   : > { %v968_v11 = vpop.f32.mrf.mxu0 }
 0x125   : > { %v1003_v44 = vpop.f32.mrf.mxu1  ;;  %v969_v45 = vadd.f32 %v968_v11, %v967_v43 }
 0x126   : > { %v1004_v46 = vadd.f32 %v1003_v44, %v1002_v41 }
 0x128   : > { %v592_v51 = vadd.f32 %v1004_v46, %v969_v45 }
 0x144   : > { %v1037_v47 = vpop.f32.mrf.mxu0 }
 0x145   : > { %v1072_v48 = vpop.f32.mrf.mxu1 }
 0x146   : > { %v1038_v49 = vpop.f32.mrf.mxu0 }
 0x147   : > { %v1073_v50 = vpop.f32.mrf.mxu1  ;;  %v1039_v24 = vadd.f32 %v1038_v49, %v1037_v47 }
 0x148   : > { %v1074_v54 = vadd.f32 %v1073_v50, %v1072_v48 }
 0x149   : > { %v662_v52 = vadd.f32 %v1039_v24, %v592_v51 }
 0x14b   : > { %v732_v55 = vadd.f32 %v1074_v54, %v662_v52 }
 0x14d   : > { %736 = vst [vmem:[%s245_s19] sm:$0xff] %v732_v55 }
 0x14e   : > { %1215 = shalt.err (!%p1212_p1)
}
 0x14f   : > { %s1216_s0 = scalar_lea.hbm %s766_s10, 128  ;;  %s1220_s24 = scalar_lea.hbm %s1718_s2, 256 }
 0x150   : > { %p1217_p10 = scmp.ne.s32.totalorder %s766_s10, %s1216_s0  ;;  %p1221_p8 = scmp.lt.s32.totalorder %s766_s10, %s1718_s2 }
 0x151   : > { %p1222_p0 = scmp.lt.s32.totalorder %s1220_s24, %s1216_s0 }
 0x152   : > { %p1218_p13 = pnand %p1217_p10, %p1366_p9 }
 0x153   : > { %p1223_p2 = por %p1222_p0, %p1221_p8 }
 0x154   : > { %p1219_p3 = pneg %p1218_p13 }
 0x156   : > { %p1224_p12 = pnand %p1223_p2, %p1219_p3 }
 0x158   : > { %1227 = shalt.err (!%p1224_p12)
}
 0x159   : > { %1079 = dma.vmem_to_hbm [thread:$0]  (%p1366_p9), %s769_s21, 128, %s766_s10, %s751_s22  }
 0x15a PF: > { %s783_s7 = sand.u32 1, %s1266_s12   ;;  %p1728_p5 = scmp.ge.s32.totalorder %s1286_s17, 2 }
 0x15b   : > { %s784_s11 = scalar_lea.sflag [#allocation4], %s783_s7 }
 0x15c   : > { %p1089_p6 = pnand %p1728_p5, %p1373_p11 }
 0x15e   : > { %p1090_p4 = pneg %p1089_p6 }
 0x160   : > { %1261 = dma.done.wait (%p1090_p4), %s784_s11, 128  }
 0x161   : > { %1263 = vsyncadd (%p1090_p4), %s784_s11, 4294967168  ;;  %s23_s17 = sadd.s32 1, %s1286_s17   ;;  %s1729_s12 = smov %s1270_s13 }
 0x162   : > { %p20_p7 = scmp.ge.s32.totalorder %s23_s17, 4   ;;  %s1730_s13 = smov %s1274_s14 }
 0x163   : > { %s1731_s14 = smov %s1371_s26  ;;  %s1732_s15 = smov %s1282_s16 }
 0x164   : > { %s1733_s16 = smov %s1735_s20  ;;  %22 = sbr.rel (!%p20_p7) target bundleno = 10 (0xa), region = 102 }
 0x169   :  { %796 = vsyncpa [#allocation3], 1 }
 0x16a   :  { %798 = vsyncpa [#allocation3 + $0x1], 1 }
 0x16b   :  { %799 = vsyncpa [#allocation6], 1 }
 0x16c   :  { %801 = vsyncpa [#allocation6 + $0x1], 1 }
 0x16d   :  { %802 = vsyncpa [#allocation4], 1 }
 0x16e   :  { %804 = vsyncpa [#allocation4 + $0x1], 1 }

</bundles_post_ra>
